<compile_context>
chip_gen: v7x
topology: tpu7x:2x2x1
jax: 0.10.0
libtpu: 0.0.40
codegen_flags: <defaults>
</compile_context>

<pallas_src>
import functools

import numpy as np
import jax
import jax.numpy as jnp
from jax.experimental import pallas as pl
from jax.experimental.pallas import tpu as pltpu


# ----------------------------------------------------------------------------
# small helpers
# ----------------------------------------------------------------------------
def _round_up(v, m):
    return (v + m - 1) // m * m


def _row_tile(M, tm):
    # multiple of 16 so bf16 blocks are sublane-pack friendly; shrink for small M
    t = max(16, min(_round_up(tm, 16), _round_up(M, 16)))
    return t, _round_up(M, t)


def _vmem_limit(nbytes):
    return int(min(max(2 * nbytes, 16 * 1024 * 1024), 64 * 1024 * 1024))


# ----------------------------------------------------------------------------
# spec helpers (exact ports of the torch helpers, computed statically / in jnp)
# ----------------------------------------------------------------------------
def get_window_size(x_size, window_size, shift_size=None):
    use_window_size = list(window_size)
    use_shift_size = list(shift_size) if shift_size is not None else None
    for i in range(len(x_size)):
        if x_size[i] <= window_size[i]:
            use_window_size[i] = x_size[i]
            if shift_size is not None:
                use_shift_size[i] = 0
    if shift_size is None:
        return tuple(use_window_size)
    return tuple(use_window_size), tuple(use_shift_size)


def window_partition(x, ws):
    # works for both numpy and jnp arrays
    B, D, H, W, C = x.shape
    x = x.reshape(B, D // ws[0], ws[0], H // ws[1], ws[1], W // ws[2], ws[2], C)
    x = x.transpose(0, 1, 3, 5, 2, 4, 6, 7)
    return x.reshape(-1, ws[0] * ws[1] * ws[2], C)


def window_reverse(windows, ws, B, D, H, W):
    x = windows.reshape(B, D // ws[0], H // ws[1], W // ws[2], ws[0], ws[1], ws[2], -1)
    x = x.transpose(0, 1, 4, 2, 5, 3, 6, 7)
    return x.reshape(B, D, H, W, -1)


def compute_mask(Dp, Hp, Wp, window_size, shift_size):
    # static (numpy) replication of the torch compute_mask
    img_mask = np.zeros((1, Dp, Hp, Wp, 1), np.float32)
    cnt = 0
    for d in (slice(-window_size[0]), slice(-window_size[0], -shift_size[0]),
              slice(-shift_size[0], None)):
        for h in (slice(-window_size[1]), slice(-window_size[1], -shift_size[1]),
                  slice(-shift_size[1], None)):
            for w in (slice(-window_size[2]), slice(-window_size[2], -shift_size[2]),
                      slice(-shift_size[2], None)):
                img_mask[:, d, h, w, :] = cnt
                cnt += 1
    mask_windows = window_partition(img_mask, window_size).squeeze(-1)   # (nW, N)
    attn_mask = mask_windows[:, None, :] - mask_windows[:, :, None]
    attn_mask = np.where(attn_mask != 0, -100.0, 0.0).astype(np.float32)
    return attn_mask


def relative_position_index(window_size):
    wd, wh, ww = window_size
    coords = np.stack(np.meshgrid(np.arange(wd), np.arange(wh), np.arange(ww),
                                  indexing="ij"))
    coords_flatten = coords.reshape(3, -1)
    rel = coords_flatten[:, :, None] - coords_flatten[:, None, :]
    rel = np.ascontiguousarray(rel.transpose(1, 2, 0)).astype(np.int64)
    rel[:, :, 0] += wd - 1
    rel[:, :, 1] += wh - 1
    rel[:, :, 2] += ww - 1
    rel[:, :, 0] *= (2 * wh - 1) * (2 * ww - 1)
    rel[:, :, 1] *= (2 * ww - 1)
    return rel.sum(-1)   # (N, N) int


# ----------------------------------------------------------------------------
# Pallas kernel 1: LayerNorm (norm1)
# ----------------------------------------------------------------------------
def _ln_kernel(x_ref, g_ref, b_ref, o_ref):
    x = x_ref[...].astype(jnp.float32)
    mu = jnp.mean(x, axis=-1, keepdims=True)
    xc = x - mu
    var = jnp.mean(xc * xc, axis=-1, keepdims=True)
    y = xc * jax.lax.rsqrt(var + 1e-5)
    y = y * g_ref[...] + b_ref[...]
    o_ref[...] = y.astype(o_ref.dtype)


def layer_norm(x, gamma, beta, *, out_dtype=jnp.bfloat16, tm=256):
    M, C = x.shape
    tm_eff, M_p = _row_tile(M, tm)
    x_p = jnp.pad(x, ((0, M_p - M), (0, 0)))
    g = gamma.astype(jnp.float32).reshape(1, C)
    b = beta.astype(jnp.float32).reshape(1, C)
    ws = 2 * tm_eff * C * (x.dtype.itemsize + jnp.dtype(out_dtype).itemsize) + 2 * C * 4
    out = pl.pallas_call(
        _ln_kernel,
        out_shape=jax.ShapeDtypeStruct((M_p, C), out_dtype),
        grid_spec=pltpu.PrefetchScalarGridSpec(
            num_scalar_prefetch=0,
            grid=(M_p // tm_eff,),
            in_specs=[
                pl.BlockSpec((tm_eff, C), lambda i: (i, 0)),
                pl.BlockSpec((1, C), lambda i: (0, 0)),
                pl.BlockSpec((1, C), lambda i: (0, 0)),
            ],
            out_specs=pl.BlockSpec((tm_eff, C), lambda i: (i, 0)),
        ),
        compiler_params=pltpu.CompilerParams(
            dimension_semantics=("parallel",),
            vmem_limit_bytes=_vmem_limit(ws)),
    )(x_p, g, b)
    return out[:M]


# ----------------------------------------------------------------------------
# Pallas kernel 2: Linear (qkv projection, attention output projection)
# ----------------------------------------------------------------------------
def _linear_kernel(x_ref, w_ref, b_ref, o_ref):
    y = jnp.dot(x_ref[...].astype(w_ref.dtype), w_ref[...],
                preferred_element_type=jnp.float32)
    o_ref[...] = (y + b_ref[...]).astype(o_ref.dtype)


def linear(x, w, b, *, out_dtype=jnp.float32, compute_dtype=jnp.bfloat16, tm=256):
    M, K = x.shape
    N = w.shape[1]
    tm_eff, M_p = _row_tile(M, tm)
    x_p = jnp.pad(x, ((0, M_p - M), (0, 0)))
    w_c = w.astype(compute_dtype)
    b_c = b.astype(jnp.float32).reshape(1, N)
    cdt = jnp.dtype(compute_dtype).itemsize
    odt = jnp.dtype(out_dtype).itemsize
    ws = (2 * (K * N * cdt + N * 4)
          + 2 * tm_eff * (K * x.dtype.itemsize + N * odt)
          + tm_eff * N * 4)
    out = pl.pallas_call(
        _linear_kernel,
        out_shape=jax.ShapeDtypeStruct((M_p, N), out_dtype),
        grid_spec=pltpu.PrefetchScalarGridSpec(
            num_scalar_prefetch=0,
            grid=(M_p // tm_eff,),
            in_specs=[
                pl.BlockSpec((tm_eff, K), lambda i: (i, 0)),   # activation tile
                pl.BlockSpec((K, N), lambda i: (0, 0)),        # weight (resident)
                pl.BlockSpec((1, N), lambda i: (0, 0)),        # bias (f32)
            ],
            out_specs=pl.BlockSpec((tm_eff, N), lambda i: (i, 0)),
        ),
        compiler_params=pltpu.CompilerParams(
            dimension_semantics=("parallel",),
            vmem_limit_bytes=_vmem_limit(ws)),
        cost_estimate=pl.CostEstimate(
            flops=2 * M_p * K * N,
            transcendentals=0,
            bytes_accessed=M_p * K * x.dtype.itemsize + K * N * cdt + M_p * N * odt),
    )(x_p, w_c, b_c)
    return out[:M]


# ----------------------------------------------------------------------------
# Pallas kernel 3: window attention core (scores + rel-pos bias + mask + softmax + PV)
# ----------------------------------------------------------------------------
def _attn_kernel(q_ref, k_ref, v_ref, bias_ref, mask_ref, o_ref, *, scale):
    # q/k/v/o blocks: (1, nW*H, N, hd); bias: (H, N, N) f32; mask: (nW, N, N) f32
    q = q_ref[...][0]
    k = k_ref[...][0]
    v = v_ref[...][0]
    nW = mask_ref.shape[0]
    H = bias_ref.shape[0]
    WH, N, _ = q.shape

    s = jnp.einsum("bnd,bmd->bnm", q, k,
                   preferred_element_type=jnp.float32)           # (nW*H, N, N)
    s = s * scale
    s = s.reshape(nW, H, N, N)
    s = s + bias_ref[...][None, :, :, :] + mask_ref[...][:, None, :, :]

    m = jnp.max(s, axis=-1, keepdims=True)
    p = jnp.exp(s - m)
    l = jnp.sum(p, axis=-1, keepdims=True)
    p = p * pl.reciprocal(l, approx=True)
    p = p.reshape(WH, N, N)

    o = jnp.einsum("bnm,bmd->bnd", p.astype(v.dtype), v,
                   preferred_element_type=jnp.float32)
    o_ref[...] = o.astype(o_ref.dtype)[None]


def window_attention_core(q, k, v, bias, mask, scale, *, out_dtype=jnp.bfloat16):
    # q,k,v: (B, nW*H, N, hd); bias: (H, N, N) f32; mask: (nW, N, N) f32
    B, WH, N, hd = q.shape
    nW = mask.shape[0]
    H = bias.shape[0]
    kern = functools.partial(_attn_kernel, scale=scale)
    qkv_bytes = WH * N * hd * q.dtype.itemsize
    ws = (2 * (3 * qkv_bytes + WH * N * hd * jnp.dtype(out_dtype).itemsize)
          + 2 * (H + nW) * N * N * 4
          + 3 * WH * N * N * 4)
    out = pl.pallas_call(
        kern,
        out_shape=jax.ShapeDtypeStruct((B, WH, N, hd), out_dtype),
        grid_spec=pltpu.PrefetchScalarGridSpec(
            num_scalar_prefetch=0,
            grid=(B,),
            in_specs=[
                pl.BlockSpec((1, WH, N, hd), lambda b: (b, 0, 0, 0)),
                pl.BlockSpec((1, WH, N, hd), lambda b: (b, 0, 0, 0)),
                pl.BlockSpec((1, WH, N, hd), lambda b: (b, 0, 0, 0)),
                pl.BlockSpec((H, N, N), lambda b: (0, 0, 0)),     # rel-pos bias (resident)
                pl.BlockSpec((nW, N, N), lambda b: (0, 0, 0)),    # shift mask  (resident)
            ],
            out_specs=pl.BlockSpec((1, WH, N, hd), lambda b: (b, 0, 0, 0)),
        ),
        compiler_params=pltpu.CompilerParams(
            dimension_semantics=("parallel",),
            vmem_limit_bytes=_vmem_limit(ws)),
        cost_estimate=pl.CostEstimate(
            flops=4 * B * WH * N * N * hd,
            transcendentals=B * WH * N * N,
            bytes_accessed=B * 4 * qkv_bytes + (H + nW) * N * N * 4),
    )(q, k, v, bias, mask)
    return out


# ----------------------------------------------------------------------------
# Pallas kernel 4: fused norm2 + MLP(GELU) + residual
# ----------------------------------------------------------------------------
def _ln_mlp_kernel(x_ref, g_ref, b_ref, w1_ref, b1_ref, w2_ref, b2_ref, o_ref):
    x = x_ref[...].astype(jnp.float32)
    mu = jnp.mean(x, axis=-1, keepdims=True)
    xc = x - mu
    var = jnp.mean(xc * xc, axis=-1, keepdims=True)
    xn = xc * jax.lax.rsqrt(var + 1e-5)
    xn = xn * g_ref[...] + b_ref[...]
    h = jnp.dot(xn.astype(w1_ref.dtype), w1_ref[...],
                preferred_element_type=jnp.float32) + b1_ref[...]
    h = jax.nn.gelu(h, approximate=False)     # exact (erf) GELU, as nn.GELU default
    y = jnp.dot(h.astype(w2_ref.dtype), w2_ref[...],
                preferred_element_type=jnp.float32) + b2_ref[...]
    o_ref[...] = (x + y).astype(o_ref.dtype)  # residual fused


def ln_mlp_residual(x, gamma, beta, w1, b1, w2, b2, *,
                    compute_dtype=jnp.bfloat16, tm=256):
    M, C = x.shape
    Hd = w1.shape[1]
    tm_eff, M_p = _row_tile(M, tm)
    x_p = jnp.pad(x, ((0, M_p - M), (0, 0)))
    g = gamma.astype(jnp.float32).reshape(1, C)
    b = beta.astype(jnp.float32).reshape(1, C)
    w1c = w1.astype(compute_dtype)
    w2c = w2.astype(compute_dtype)
    b1c = b1.astype(jnp.float32).reshape(1, Hd)
    b2c = b2.astype(jnp.float32).reshape(1, C)
    cdt = jnp.dtype(compute_dtype).itemsize
    ws = (2 * (2 * C * Hd * cdt + (Hd + 3 * C) * 4)
          + 4 * tm_eff * C * x.dtype.itemsize
          + tm_eff * (Hd + C) * 4)
    out = pl.pallas_call(
        _ln_mlp_kernel,
        out_shape=jax.ShapeDtypeStruct((M_p, C), x.dtype),
        grid_spec=pltpu.PrefetchScalarGridSpec(
            num_scalar_prefetch=0,
            grid=(M_p // tm_eff,),
            in_specs=[
                pl.BlockSpec((tm_eff, C), lambda i: (i, 0)),
                pl.BlockSpec((1, C), lambda i: (0, 0)),
                pl.BlockSpec((1, C), lambda i: (0, 0)),
                pl.BlockSpec((C, Hd), lambda i: (0, 0)),
                pl.BlockSpec((1, Hd), lambda i: (0, 0)),
                pl.BlockSpec((Hd, C), lambda i: (0, 0)),
                pl.BlockSpec((1, C), lambda i: (0, 0)),
            ],
            out_specs=pl.BlockSpec((tm_eff, C), lambda i: (i, 0)),
        ),
        compiler_params=pltpu.CompilerParams(
            dimension_semantics=("parallel",),
            vmem_limit_bytes=_vmem_limit(ws)),
        cost_estimate=pl.CostEstimate(
            flops=4 * M_p * C * Hd,
            transcendentals=M_p * Hd,
            bytes_accessed=2 * M_p * C * x.dtype.itemsize + 2 * C * Hd * cdt),
    )(x_p, g, b, w1c, b1c, w2c, b2c)
    return out[:M]


# ----------------------------------------------------------------------------
# WindowAttention3D / SwinTransformerBlock3D / BasicLayer wrappers
# ----------------------------------------------------------------------------
def window_attention(x_windows, p, num_heads, mask, nW):
    # x_windows: (B*nW, N, C), bf16 (output of norm1, padded/shifted/partitioned)
    Bw, N, C = x_windows.shape
    hd = C // num_heads
    scale = float(hd) ** -0.5

    qkv = linear(x_windows.reshape(-1, C), p["qkv_w"], p["qkv_b"],
                 out_dtype=jnp.bfloat16)                               # (Bw*N, 3C)
    qkv = qkv.reshape(Bw, N, 3, num_heads, hd).transpose(2, 0, 3, 1, 4)
    q, k, v = qkv[0], qkv[1], qkv[2]                                   # (Bw, H, N, hd)

    idx = np.asarray(p["rel_index"])[:N, :N].reshape(-1)
    bias = jnp.take(p["rel_table"], jnp.asarray(idx), axis=0)
    bias = bias.reshape(N, N, num_heads).transpose(2, 0, 1).astype(jnp.float32)

    if mask is None:
        mask_arr = jnp.zeros((nW, N, N), jnp.float32)
    else:
        mask_arr = jnp.asarray(mask, jnp.float32)

    B = Bw // nW
    qb = q.reshape(B, nW * num_heads, N, hd)
    kb = k.reshape(B, nW * num_heads, N, hd)
    vb = v.reshape(B, nW * num_heads, N, hd)

    o = window_attention_core(qb, kb, vb, bias, mask_arr, scale)       # (B, nW*H, N, hd)
    o = o.reshape(Bw, num_heads, N, hd).transpose(0, 2, 1, 3).reshape(Bw, N, C)

    out = linear(o.reshape(-1, C), p["proj_w"], p["proj_b"], out_dtype=jnp.float32)
    return out.reshape(Bw, N, C)


def swin_block_forward(x, p, window_size_cfg, shift_size_cfg, num_heads, attn_mask_full):
    # x: (B, D, H, W, C) f32
    B, D, H, W, C = x.shape
    window_size, shift_size = get_window_size((D, H, W), window_size_cfg, shift_size_cfg)
    shortcut = x

    # norm1 (before padding, as in torch; padded tokens stay exactly zero)
    xn = layer_norm(x.reshape(-1, C), p["norm1_g"], p["norm1_b"],
                    out_dtype=jnp.bfloat16).reshape(B, D, H, W, C)

    pad_d = (-D) % window_size[0]
    pad_h = (-H) % window_size[1]
    pad_w = (-W) % window_size[2]
    xp = jnp.pad(xn, ((0, 0), (0, pad_d), (0, pad_h), (0, pad_w), (0, 0)))
    Dp, Hp, Wp = D + pad_d, H + pad_h, W + pad_w
    nW = (Dp // window_size[0]) * (Hp // window_size[1]) * (Wp // window_size[2])

    if any(s > 0 for s in shift_size):
        xs = jnp.roll(xp, shift=(-shift_size[0], -shift_size[1], -shift_size[2]),
                      axis=(1, 2, 3))
        mask = attn_mask_full
    else:
        xs = xp
        mask = None

    x_windows = window_partition(xs, window_size)                      # (B*nW, N, C)
    attn_windows = window_attention(x_windows, p, num_heads, mask, nW)
    attn_windows = attn_windows.reshape((-1,) + tuple(window_size) + (C,))
    xs = window_reverse(attn_windows, window_size, B, Dp, Hp, Wp)

    if any(s > 0 for s in shift_size):
        xp = jnp.roll(xs, shift=tuple(shift_size), axis=(1, 2, 3))
    else:
        xp = xs
    x = shortcut + xp[:, :D, :H, :W, :]                                # drop_path=0

    # norm2 + MLP + residual fused in one Pallas kernel
    x = ln_mlp_residual(x.reshape(-1, C), p["norm2_g"], p["norm2_b"],
                        p["fc1_w"], p["fc1_b"], p["fc2_w"], p["fc2_b"]
                        ).reshape(B, D, H, W, C)
    return x


def basic_layer_forward(x, params, *, window_size, num_heads):
    # x: (B, C, D, H, W)
    B, C, D, H, W = x.shape
    shift_cfg = tuple(i // 2 for i in window_size)
    ws, ss = get_window_size((D, H, W), window_size, shift_cfg)
    x = jnp.transpose(x, (0, 2, 3, 4, 1))                              # b c d h w -> b d h w c
    Dp = int(np.ceil(D / ws[0])) * ws[0]
    Hp = int(np.ceil(H / ws[1])) * ws[1]
    Wp = int(np.ceil(W / ws[2])) * ws[2]
    attn_mask = jnp.asarray(compute_mask(Dp, Hp, Wp, ws, ss))
    for i, p in enumerate(params["blocks"]):
        blk_shift = (0, 0, 0) if i % 2 == 0 else shift_cfg
        x = swin_block_forward(x, p, window_size, blk_shift, num_heads, attn_mask)
    x = x.reshape(B, D, H, W, -1)
    # TODO(synk): downsample (PatchMerging) not instantiated (BasicLayer default None)
    return jnp.transpose(x, (0, 4, 1, 2, 3))                           # b d h w c -> b c d h w


# ----------------------------------------------------------------------------
# pure-JAX f32 reference (mirrors the torch module exactly)
# ----------------------------------------------------------------------------
def _ref_layer_norm(x, g, b, eps=1e-5):
    mu = jnp.mean(x, -1, keepdims=True)
    var = jnp.mean((x - mu) ** 2, -1, keepdims=True)
    return (x - mu) / jnp.sqrt(var + eps) * g + b


def _ref_mlp(x, p):
    h = x @ p["fc1_w"] + p["fc1_b"]
    h = jax.nn.gelu(h, approximate=False)
    return h @ p["fc2_w"] + p["fc2_b"]


def _ref_window_attention(xw, p, num_heads, mask):
    Bw, N, C = xw.shape
    hd = C // num_heads
    scale = float(hd) ** -0.5
    qkv = xw @ p["qkv_w"] + p["qkv_b"]
    qkv = qkv.reshape(Bw, N, 3, num_heads, hd).transpose(2, 0, 3, 1, 4)
    q, k, v = qkv[0] * scale, qkv[1], qkv[2]
    attn = jnp.einsum("bhnd,bhmd->bhnm", q, k)
    idx = np.asarray(p["rel_index"])[:N, :N].reshape(-1)
    bias = jnp.take(p["rel_table"], jnp.asarray(idx), axis=0)
    bias = bias.reshape(N, N, num_heads).transpose(2, 0, 1)
    attn = attn + bias[None]
    if mask is not None:
        nW = mask.shape[0]
        attn = attn.reshape(Bw // nW, nW, num_heads, N, N) + mask[None, :, None]
        attn = attn.reshape(-1, num_heads, N, N)
    attn = jax.nn.softmax(attn, axis=-1)
    o = jnp.einsum("bhnm,bhmd->bhnd", attn, v).transpose(0, 2, 1, 3).reshape(Bw, N, C)
    return o @ p["proj_w"] + p["proj_b"]


def _ref_block(x, p, window_size_cfg, shift_size_cfg, num_heads, attn_mask):
    B, D, H, W, C = x.shape
    ws, ss = get_window_size((D, H, W), window_size_cfg, shift_size_cfg)
    shortcut = x
    xn = _ref_layer_norm(x, p["norm1_g"], p["norm1_b"])
    pad_d, pad_h, pad_w = (-D) % ws[0], (-H) % ws[1], (-W) % ws[2]
    xp = jnp.pad(xn, ((0, 0), (0, pad_d), (0, pad_h), (0, pad_w), (0, 0)))
    Dp, Hp, Wp = D + pad_d, H + pad_h, W + pad_w
    if any(s > 0 for s in ss):
        xs = jnp.roll(xp, (-ss[0], -ss[1], -ss[2]), (1, 2, 3))
        mask = attn_mask
    else:
        xs, mask = xp, None
    xw = window_partition(xs, ws)
    aw = _ref_window_attention(xw, p, num_heads, mask)
    aw = aw.reshape((-1,) + tuple(ws) + (C,))
    xs = window_reverse(aw, ws, B, Dp, Hp, Wp)
    if any(s > 0 for s in ss):
        xp = jnp.roll(xs, tuple(ss), (1, 2, 3))
    else:
        xp = xs
    x = shortcut + xp[:, :D, :H, :W, :]
    return x + _ref_mlp(_ref_layer_norm(x, p["norm2_g"], p["norm2_b"]), p)


def _ref_basic_layer(x, params, *, window_size, num_heads):
    B, C, D, H, W = x.shape
    shift_cfg = tuple(i // 2 for i in window_size)
    ws, ss = get_window_size((D, H, W), window_size, shift_cfg)
    x = jnp.transpose(x, (0, 2, 3, 4, 1))
    Dp = int(np.ceil(D / ws[0])) * ws[0]
    Hp = int(np.ceil(H / ws[1])) * ws[1]
    Wp = int(np.ceil(W / ws[2])) * ws[2]
    attn_mask = jnp.asarray(compute_mask(Dp, Hp, Wp, ws, ss))
    for i, p in enumerate(params["blocks"]):
        blk_shift = (0, 0, 0) if i % 2 == 0 else shift_cfg
        x = _ref_block(x, p, window_size, blk_shift, num_heads, attn_mask)
    x = x.reshape(B, D, H, W, -1)
    return jnp.transpose(x, (0, 4, 1, 2, 3))


# ----------------------------------------------------------------------------
# parameter construction (deterministic, weights stored as (in, out))
# ----------------------------------------------------------------------------
def init_params(key, dim, depth, num_heads, window_size, mlp_ratio=4.0, qkv_bias=False):
    hidden = int(dim * mlp_ratio)
    table_size = ((2 * window_size[0] - 1) * (2 * window_size[1] - 1)
                  * (2 * window_size[2] - 1))
    rel_index = relative_position_index(window_size)
    blocks = []
    for _ in range(depth):
        key, *ks = jax.random.split(key, 14)
        blk = dict(
            norm1_g=1.0 + 0.1 * jax.random.normal(ks[0], (dim,), jnp.float32),
            norm1_b=0.05 * jax.random.normal(ks[1], (dim,), jnp.float32),
            qkv_w=0.05 * jax.random.normal(ks[2], (dim, 3 * dim), jnp.float32),
            qkv_b=(0.05 * jax.random.normal(ks[3], (3 * dim,), jnp.float32)
                   if qkv_bias else jnp.zeros((3 * dim,), jnp.float32)),
            proj_w=0.05 * jax.random.normal(ks[4], (dim, dim), jnp.float32),
            proj_b=0.02 * jax.random.normal(ks[5], (dim,), jnp.float32),
            rel_table=0.02 * jax.random.normal(ks[6], (table_size, num_heads), jnp.float32),
            rel_index=rel_index,
            norm2_g=1.0 + 0.1 * jax.random.normal(ks[7], (dim,), jnp.float32),
            norm2_b=0.05 * jax.random.normal(ks[8], (dim,), jnp.float32),
            fc1_w=0.05 * jax.random.normal(ks[9], (dim, hidden), jnp.float32),
            fc1_b=0.02 * jax.random.normal(ks[10], (hidden,), jnp.float32),
            fc2_w=0.05 * jax.random.normal(ks[11], (hidden, dim), jnp.float32),
            fc2_b=0.02 * jax.random.normal(ks[12], (dim,), jnp.float32),
        )
        blocks.append(blk)
    return dict(blocks=blocks)


def _run_case(x, params, window_size, num_heads):
    out = jax.block_until_ready(
        basic_layer_forward(x, params, window_size=window_size, num_heads=num_heads))
    ref = jax.block_until_ready(
        _ref_basic_layer(x, params, window_size=window_size, num_heads=num_heads))
    assert out.shape == x.shape
    # bf16 matmul operands with f32 accumulation -> loosened tolerance vs f32 ref.
    assert jnp.allclose(out, ref, atol=2e-2, rtol=2e-2), \
        f"max abs err {float(jnp.max(jnp.abs(out - ref)))}"


if __name__ == "__main__":
    # Small shapes consistent with the module: (B, C, D, H, W) input,
    # window (2, 4, 4) -> N = 32 tokens per window, 4 heads, mlp_ratio = 4,
    # depth = 2 (block 0: W-MSA, block 1: shifted SW-MSA with attention mask).
    B, C, D, H, W = 2, 32, 4, 8, 8
    window_size = (2, 4, 4)
    num_heads = 4
    depth = 2

    key = jax.random.PRNGKey(0)
    kx, kp, kx2 = jax.random.split(key, 3)
    x = jax.random.normal(kx, (B, C, D, H, W), jnp.float32)
    params = init_params(kp, C, depth, num_heads, window_size,
                         mlp_ratio=4.0, qkv_bias=False)

    # case 1: evenly divisible spatial dims (no padding)
    _run_case(x, params, window_size, num_heads)

    # case 2: spatial dims not divisible by the window -> exercises the zero-pad,
    # partial-window and masked shifted-attention paths.
    x2 = jax.random.normal(kx2, (B, C, 3, 7, 9), jnp.float32)
    _run_case(x2, params, window_size, num_heads)

    print("KERNEL_OK")
</pallas_src>

<mosaic_0001>
module attributes {stable_mosaic.version = 11 : i64} {
  func.func @_ln_kernel(%arg0: i32, %arg1: memref<256x32xf32, #tpu.memory_space<vmem>>, %arg2: memref<1x32xf32, #tpu.memory_space<vmem>>, %arg3: memref<1x32xf32, #tpu.memory_space<vmem>>, %arg4: memref<256x32xbf16, #tpu.memory_space<vmem>>) attributes {dimension_semantics = [#tpu.dimension_semantics<parallel>], iteration_bounds = array<i64: 2>, scalar_prefetch = 0 : i64, scratch_operands = 0 : i64, tpu.core_type = #tpu.core_type<tc>, window_params = [{transform_indices = @transform_0, window_bounds = array<i64: 256, 32>}, {pipeline_mode = #tpu.pipeline_mode<synchronous>, transform_indices = @transform_1, window_bounds = array<i64: 1, 32>}, {pipeline_mode = #tpu.pipeline_mode<synchronous>, transform_indices = @transform_2, window_bounds = array<i64: 1, 32>}, {transform_indices = @transform_3, window_bounds = array<i64: 256, 32>}]} {
    %c0 = arith.constant 0 : index
    %c0_0 = arith.constant 0 : index
    %0 = vector.load %arg1[%c0, %c0_0] : memref<256x32xf32, #tpu.memory_space<vmem>>, vector<256x32xf32>
    %cst = arith.constant dense<0.000000e+00> : vector<256xf32>
    %1 = vector.multi_reduction <add>, %0, %cst [1] : vector<256x32xf32> to vector<256xf32>
    %2 = vector.shape_cast %1 : vector<256xf32> to vector<256x1xf32>
    %cst_1 = arith.constant 3.200000e+01 : f32
    %3 = vector.broadcast %cst_1 : f32 to vector<256x1xf32>
    %4 = arith.divf %2, %3 : vector<256x1xf32>
    %5 = vector.broadcast %4 : vector<256x1xf32> to vector<256x32xf32>
    %6 = arith.subf %0, %5 : vector<256x32xf32>
    %7 = arith.mulf %6, %6 : vector<256x32xf32>
    %cst_2 = arith.constant dense<0.000000e+00> : vector<256xf32>
    %8 = vector.multi_reduction <add>, %7, %cst_2 [1] : vector<256x32xf32> to vector<256xf32>
    %9 = vector.shape_cast %8 : vector<256xf32> to vector<256x1xf32>
    %cst_3 = arith.constant 3.200000e+01 : f32
    %10 = vector.broadcast %cst_3 : f32 to vector<256x1xf32>
    %11 = arith.divf %9, %10 : vector<256x1xf32>
    %cst_4 = arith.constant 9.99999974E-6 : f32
    %12 = vector.broadcast %cst_4 : f32 to vector<256x1xf32>
    %13 = arith.addf %11, %12 : vector<256x1xf32>
    %14 = math.rsqrt %13 : vector<256x1xf32>
    %15 = vector.broadcast %14 : vector<256x1xf32> to vector<256x32xf32>
    %16 = arith.mulf %6, %15 : vector<256x32xf32>
    %c0_5 = arith.constant 0 : index
    %c0_6 = arith.constant 0 : index
    %17 = vector.load %arg2[%c0_5, %c0_6] : memref<1x32xf32, #tpu.memory_space<vmem>>, vector<1x32xf32>
    %18 = vector.broadcast %17 : vector<1x32xf32> to vector<256x32xf32>
    %19 = arith.mulf %16, %18 : vector<256x32xf32>
    %c0_7 = arith.constant 0 : index
    %c0_8 = arith.constant 0 : index
    %20 = vector.load %arg3[%c0_7, %c0_8] : memref<1x32xf32, #tpu.memory_space<vmem>>, vector<1x32xf32>
    %21 = vector.broadcast %20 : vector<1x32xf32> to vector<256x32xf32>
    %22 = arith.addf %19, %21 : vector<256x32xf32>
    %23 = arith.truncf %22 : vector<256x32xf32> to vector<256x32xbf16>
    %c0_9 = arith.constant 0 : index
    %c0_10 = arith.constant 0 : index
    %24 = vector.load %arg4[%c0_9, %c0_10] : memref<256x32xbf16, #tpu.memory_space<vmem>>, vector<256x32xbf16>
    tpu.vector_store %arg4[%c0_9, %c0_10], %23 {strides = array<i32>} : memref<256x32xbf16, #tpu.memory_space<vmem>>, vector<256x32xbf16>,
    return
  }
  func.func @transform_0(%arg0: i32) -> (i32, i32) {
    %c0_i32 = arith.constant 0 : i32
    %c0_i32_0 = arith.constant 0 : i32
    return %arg0, %c0_i32 : i32, i32
  }
  func.func @transform_1(%arg0: i32) -> (i32, i32) {
    %c0_i32 = arith.constant 0 : i32
    %c0_i32_0 = arith.constant 0 : i32
    %c0_i32_1 = arith.constant 0 : i32
    return %c0_i32, %c0_i32_0 : i32, i32
  }
  func.func @transform_2(%arg0: i32) -> (i32, i32) {
    %c0_i32 = arith.constant 0 : i32
    %c0_i32_0 = arith.constant 0 : i32
    %c0_i32_1 = arith.constant 0 : i32
    return %c0_i32, %c0_i32_0 : i32, i32
  }
  func.func @transform_3(%arg0: i32) -> (i32, i32) {
    %c0_i32 = arith.constant 0 : i32
    %c0_i32_0 = arith.constant 0 : i32
    return %arg0, %c0_i32 : i32, i32
  }
}

</mosaic_0001>

<bundles_post_ra>
// kernel: tpu_custom_call.1
= control target key start
LH: loop header
LB: loop body
LE: loop exit
PB: predicated region body
PF: predicated region fallthrough
CT: control target
= control target key end

     0   :  { %s1096_s12 = smov 0   ;;  %s1643_s0 = inlined_call_operand.vmem [shape: f32[512,32], index: 0, kind: input, shape index: {}]   ;;  %s1644_s1 = inlined_call_operand.vmem [shape: f32[1,32], index: 1, kind: input, shape index: {}]   ;;  %s1645_s2 = inlined_call_operand.vmem [shape: f32[1,32], index: 2, kind: input, shape index: {}]   ;;  %s1646_s3 = inlined_call_operand.vmem [shape: bf16[512,32], index: 3, kind: output, shape index: {}]  }
   0x1 LB: > { %s919_s13 = sadd.s32 4294967295, %s1074_s12   ;;  %p923_p0 = scmp.ge.s32.totalorder %s1074_s12, 1  ;;  %s1074_s12 = sphi %s1096_s12, %s13_s12  }
   0x2   : > { %p138_p1 = scmp.lt.s32.totalorder %s1074_s12, 3 }
   0x4   : > { %p139_p2 = pnand %p923_p0, %p138_p1 }
   0x5   : > { %s924_s14 = sshll.u32 (!%p139_p2), %s919_s13, 5  ;;  %vm206_vm0 = vcmask (!%p139_p2), 261120   ;;  %vm830_vm1 = vcmask (!%p139_p2), 257024  }
   0x6   : > { %142 = sbr.rel (%p139_p2) target bundleno = 397 (0x18d), region = 32  ;;  %p163_p3 = scmp.lt.s32.totalorder (!%p139_p2), %s924_s14, 63 }
   0xd   : > { %s1648_s14 = smov (!%p163_p3, %s924_s14), 63 }
   0xe   : > { %s925_s15 = sshll.u32 %s1648_s14, 3  ;;  %s927_s23 = sshll.u32 %s1648_s14, 2 }
   0xf   : > { %s1110_s18 = scalar_lea.vmem %s1643_s0, %s925_s15  ;;  %s1482_s26 = scalar_lea.vmem %s1646_s3, %s927_s23 }
  0x10   : > { %v1113_v0 = vld [vmem:[%s1110_s18] sm:$0xff]  ;;  %v1116_v1 = vld [vmem:[%s1110_s18 + $0x10] sm:$0xff]  ;;  %v1119_v2 = vld [vmem:[%s1110_s18 + $0x8] sm:$0xff] }
  0x11   : > { %v207_v3 = vsel %vm206_vm0, %v1113_v0, 0.0  ;;  %v213_v4 = vsel %vm206_vm0, %v1116_v1, 0.0  ;;  %v1126_v5 = vld [vmem:[%s1110_s18 + $0x18] sm:$0xff]  ;;  %v210_v6 = vsel %vm206_vm0, %v1119_v2, 0.0  ;;  %v1133_v8 = vld [vmem:[%s1110_s18 + $0x20] sm:$0xff]  ;;  %v1136_v9 = vld [vmem:[%s1110_s18 + $0x28] sm:$0xff] }
  0x12   : > { %208 = vadd.xlane.f32.xlu0 %v207_v3  ;;  %214 = vadd.xlane.f32.xlu1 %v213_v4  ;;  %v216_v7 = vsel %vm206_vm0, %v1126_v5, 0.0  ;;  %v219_v10 = vsel %vm206_vm0, %v1133_v8, 0.0  ;;  %v222_v11 = vsel %vm206_vm0, %v1136_v9, 0.0  ;;  %v1143_v12 = vld [vmem:[%s1110_s18 + $0x30] sm:$0xff]  ;;  %v1146_v13 = vld [vmem:[%s1110_s18 + $0x38] sm:$0xff]  ;;  %v1153_v16 = vld [vmem:[%s1110_s18 + $0x40] sm:$0xff] }
  0x13   : > { %v225_v14 = vsel %vm206_vm0, %v1143_v12, 0.0  ;;  %v228_v15 = vsel %vm206_vm0, %v1146_v13, 0.0  ;;  %v1156_v17 = vld [vmem:[%s1110_s18 + $0x48] sm:$0xff]  ;;  %v231_v18 = vsel %vm206_vm0, %v1153_v16, 0.0  ;;  %v1163_v20 = vld [vmem:[%s1110_s18 + $0x50] sm:$0xff]  ;;  %v1166_v21 = vld [vmem:[%s1110_s18 + $0x58] sm:$0xff] }
  0x14   : > { %v234_v19 = vsel %vm206_vm0, %v1156_v17, 0.0  ;;  %v237_v22 = vsel %vm206_vm0, %v1163_v20, 0.0  ;;  %v240_v23 = vsel %vm206_vm0, %v1166_v21, 0.0  ;;  %v1173_v24 = vld [vmem:[%s1110_s18 + $0x60] sm:$0xff]  ;;  %v1176_v25 = vld [vmem:[%s1110_s18 + $0x68] sm:$0xff]  ;;  %v1183_v28 = vld [vmem:[%s1110_s18 + $0x70] sm:$0xff] }
  0x15   : > { %v243_v26 = vsel %vm206_vm0, %v1173_v24, 0.0  ;;  %v246_v27 = vsel %vm206_vm0, %v1176_v25, 0.0  ;;  %v1186_v29 = vld [vmem:[%s1110_s18 + $0x78] sm:$0xff]  ;;  %v249_v30 = vsel %vm206_vm0, %v1183_v28, 0.0  ;;  %v1193_v32 = vld [vmem:[%s1110_s18 + $0x80] sm:$0xff]  ;;  %v1196_v33 = vld [vmem:[%s1110_s18 + $0x88] sm:$0xff] }
  0x16   : > { %211 = vadd.xlane.f32.xlu0 %v210_v6  ;;  %217 = vadd.xlane.f32.xlu1 %v216_v7  ;;  %v252_v31 = vsel %vm206_vm0, %v1186_v29, 0.0  ;;  %v255_v34 = vsel %vm206_vm0, %v1193_v32, 0.0  ;;  %v258_v35 = vsel %vm206_vm0, %v1196_v33, 0.0  ;;  %v1203_v36 = vld [vmem:[%s1110_s18 + $0x90] sm:$0xff]  ;;  %v1206_v37 = vld [vmem:[%s1110_s18 + $0x98] sm:$0xff]  ;;  %v1213_v40 = vld [vmem:[%s1110_s18 + $0xa0] sm:$0xff] }
  0x17   : > { %v261_v38 = vsel %vm206_vm0, %v1203_v36, 0.0  ;;  %v264_v39 = vsel %vm206_vm0, %v1206_v37, 0.0  ;;  %v1216_v41 = vld [vmem:[%s1110_s18 + $0xa8] sm:$0xff]  ;;  %v267_v42 = vsel %vm206_vm0, %v1213_v40, 0.0  ;;  %v1223_v44 = vld [vmem:[%s1110_s18 + $0xb0] sm:$0xff]  ;;  %v1226_v45 = vld [vmem:[%s1110_s18 + $0xb8] sm:$0xff] }
  0x18   : > { %v270_v43 = vsel %vm206_vm0, %v1216_v41, 0.0  ;;  %v273_v46 = vsel %vm206_vm0, %v1223_v44, 0.0  ;;  %v276_v47 = vsel %vm206_vm0, %v1226_v45, 0.0  ;;  %v1233_v48 = vld [vmem:[%s1110_s18 + $0xc0] sm:$0xff]  ;;  %v1236_v49 = vld [vmem:[%s1110_s18 + $0xc8] sm:$0xff]  ;;  %v1243_v52 = vld [vmem:[%s1110_s18 + $0xd0] sm:$0xff] }
  0x19   : > { %v279_v50 = vsel %vm206_vm0, %v1233_v48, 0.0  ;;  %v282_v51 = vsel %vm206_vm0, %v1236_v49, 0.0  ;;  %v1246_v53 = vld [vmem:[%s1110_s18 + $0xd8] sm:$0xff]  ;;  %v285_v54 = vsel %vm206_vm0, %v1243_v52, 0.0  ;;  %v1253_v56 = vld [vmem:[%s1110_s18 + $0xe0] sm:$0xff]  ;;  %v1256_v57 = vld [vmem:[%s1110_s18 + $0xe8] sm:$0xff] }
  0x1a   : > { %220 = vadd.xlane.f32.xlu0 %v219_v10  ;;  %223 = vadd.xlane.f32.xlu1 %v222_v11  ;;  %v288_v55 = vsel %vm206_vm0, %v1246_v53, 0.0  ;;  %v291_v58 = vsel %vm206_vm0, %v1253_v56, 0.0  ;;  %v294_v59 = vsel %vm206_vm0, %v1256_v57, 0.0  ;;  %v1263_v60 = vld [vmem:[%s1110_s18 + $0xf0] sm:$0xff]  ;;  %v1266_v61 = vld [vmem:[%s1110_s18 + $0xf8] sm:$0xff] }
  0x1b   : > { %v297_v62 = vsel %vm206_vm0, %v1263_v60, 0.0  ;;  %v300_v63 = vsel %vm206_vm0, %v1266_v61, 0.0 }
  0x1e   : > { %226 = vadd.xlane.f32.xlu0 %v225_v14  ;;  %229 = vadd.xlane.f32.xlu1 %v228_v15 }
  0x22   : > { %232 = vadd.xlane.f32.xlu0 %v231_v18  ;;  %235 = vadd.xlane.f32.xlu1 %v234_v19 }
  0x26   : > { %238 = vadd.xlane.f32.xlu0 %v237_v22  ;;  %241 = vadd.xlane.f32.xlu1 %v240_v23 }
  0x2a   : > { %244 = vadd.xlane.f32.xlu0 %v243_v26  ;;  %247 = vadd.xlane.f32.xlu1 %v246_v27 }
  0x2e   : > { %250 = vadd.xlane.f32.xlu0 %v249_v30  ;;  %253 = vadd.xlane.f32.xlu1 %v252_v31 }
  0x32   : > { %256 = vadd.xlane.f32.xlu0 %v255_v34  ;;  %259 = vadd.xlane.f32.xlu1 %v258_v35 }
  0x36   : > { %262 = vadd.xlane.f32.xlu0 %v261_v38  ;;  %265 = vadd.xlane.f32.xlu1 %v264_v39 }
  0x3a   : > { %268 = vadd.xlane.f32.xlu0 %v267_v42  ;;  %271 = vadd.xlane.f32.xlu1 %v270_v43 }
  0x3e   : > { %274 = vadd.xlane.f32.xlu0 %v273_v46  ;;  %277 = vadd.xlane.f32.xlu1 %v276_v47 }
  0x42   : > { %280 = vadd.xlane.f32.xlu0 %v279_v50  ;;  %283 = vadd.xlane.f32.xlu1 %v282_v51 }
  0x46   : > { %286 = vadd.xlane.f32.xlu0 %v285_v54  ;;  %289 = vadd.xlane.f32.xlu1 %v288_v55 }
  0x4a   : > { %292 = vadd.xlane.f32.xlu0 %v291_v58  ;;  %295 = vadd.xlane.f32.xlu1 %v294_v59 }
  0x4e   : > { %298 = vadd.xlane.f32.xlu0 %v297_v62  ;;  %301 = vadd.xlane.f32.xlu1 %v300_v63 }
  0x9f   : > { %v209_v3 = vpop.xlane.xlu0 %208  ;;  %v215_v4 = vpop.xlane.xlu1 %214 }
  0xa0   : > { %v304_v6 = vmul.f32 0.03125, %v209_v3  ;;  %v306_v7 = vmul.f32 0.03125, %v215_v4 }
  0xa2   : > { %v1273_v10 = vsub.f32 %v1113_v0, %v304_v6  ;;  %v1276_v11 = vsub.f32 %v1116_v1, %v306_v7 }
  0xa3   : > { %v212_v14 = vpop.xlane.xlu0 %211  ;;  %v218_v15 = vpop.xlane.xlu1 %217 }
  0xa4   : > { %v305_v18 = vmul.f32 0.03125, %v212_v14  ;;  %v307_v19 = vmul.f32 0.03125, %v218_v15  ;;  %v368_v22 = vmul.f32 %v1273_v10, %v1273_v10  ;;  %v370_v23 = vmul.f32 %v1276_v11, %v1276_v11 }
  0xa6   : > { %v1283_v26 = vsub.f32 %v1119_v2, %v305_v18  ;;  %v1286_v27 = vsub.f32 %v1126_v5, %v307_v19  ;;  %v400_v0 = vsel %vm206_vm0, %v368_v22, 0.0  ;;  %v406_v31 = vsel %vm206_vm0, %v370_v23, 0.0 }
  0xa7   : > { %401 = vadd.xlane.f32.xlu0 %v400_v0  ;;  %v221_v1 = vpop.xlane.xlu0 %220  ;;  %v224_v30 = vpop.xlane.xlu1 %223 }
  0xa8   : > { %v308_v34 = vmul.f32 0.03125, %v221_v1  ;;  %v309_v35 = vmul.f32 0.03125, %v224_v30  ;;  %v369_v38 = vmul.f32 %v1283_v26, %v1283_v26  ;;  %v371_v39 = vmul.f32 %v1286_v27, %v1286_v27 }
  0xaa   : > { %v1295_v2 = vsub.f32 %v1133_v8, %v308_v34  ;;  %v1298_v5 = vsub.f32 %v1136_v9, %v309_v35  ;;  %v403_v42 = vsel %vm206_vm0, %v369_v38, 0.0  ;;  %v409_v47 = vsel %vm206_vm0, %v371_v39, 0.0 }
  0xab   : > { %407 = vadd.xlane.f32.xlu0 %v406_v31  ;;  %404 = vadd.xlane.f32.xlu1 %v403_v42  ;;  %v227_v43 = vpop.xlane.xlu0 %226  ;;  %v230_v46 = vpop.xlane.xlu1 %229 }
  0xac   : > { %v310_v50 = vmul.f32 0.03125, %v227_v43  ;;  %v311_v51 = vmul.f32 0.03125, %v230_v46  ;;  %v372_v54 = vmul.f32 %v1295_v2, %v1295_v2  ;;  %v373_v8 = vmul.f32 %v1298_v5, %v1298_v5 }
  0xae   : > { %v1307_v55 = vsub.f32 %v1143_v12, %v310_v50  ;;  %v1310_v9 = vsub.f32 %v1146_v13, %v311_v51  ;;  %v412_v58 = vsel %vm206_vm0, %v372_v54, 0.0  ;;  %v415_v63 = vsel %vm206_vm0, %v373_v8, 0.0 }
  0xaf   : > { %410 = vadd.xlane.f32.xlu1 %v409_v47  ;;  %413 = vadd.xlane.f32.xlu0 %v412_v58  ;;  %v233_v59 = vpop.xlane.xlu0 %232  ;;  %v236_v62 = vpop.xlane.xlu1 %235 }
  0xb0   : > { %v312_v3 = vmul.f32 0.03125, %v233_v59  ;;  %v313_v4 = vmul.f32 0.03125, %v236_v62  ;;  %v374_v6 = vmul.f32 %v1307_v55, %v1307_v55  ;;  %v375_v12 = vmul.f32 %v1310_v9, %v1310_v9 }
  0xb2   : > { %v1319_v7 = vsub.f32 %v1153_v16, %v312_v3  ;;  %v1322_v13 = vsub.f32 %v1156_v17, %v313_v4  ;;  %v418_v14 = vsel %vm206_vm0, %v374_v6, 0.0  ;;  %v421_v19 = vsel %vm206_vm0, %v375_v12, 0.0 }
  0xb3   : > { %416 = vadd.xlane.f32.xlu1 %v415_v63  ;;  %419 = vadd.xlane.f32.xlu0 %v418_v14  ;;  %v239_v15 = vpop.xlane.xlu0 %238  ;;  %v242_v18 = vpop.xlane.xlu1 %241 }
  0xb4   : > { %v314_v22 = vmul.f32 0.03125, %v239_v15  ;;  %v315_v23 = vmul.f32 0.03125, %v242_v18  ;;  %v376_v0 = vmul.f32 %v1319_v7, %v1319_v7  ;;  %v377_v16 = vmul.f32 %v1322_v13, %v1322_v13 }
  0xb6   : > { %v1331_v1 = vsub.f32 %v1163_v20, %v314_v22  ;;  %v1334_v17 = vsub.f32 %v1166_v21, %v315_v23  ;;  %v424_v30 = vsel %vm206_vm0, %v376_v0, 0.0  ;;  %v427_v35 = vsel %vm206_vm0, %v377_v16, 0.0 }
  0xb7   : > { %422 = vadd.xlane.f32.xlu1 %v421_v19  ;;  %425 = vadd.xlane.f32.xlu0 %v424_v30  ;;  %v245_v31 = vpop.xlane.xlu0 %244  ;;  %v248_v34 = vpop.xlane.xlu1 %247 }
  0xb8   : > { %v316_v38 = vmul.f32 0.03125, %v245_v31  ;;  %v317_v39 = vmul.f32 0.03125, %v248_v34  ;;  %v378_v42 = vmul.f32 %v1331_v1, %v1331_v1  ;;  %v379_v20 = vmul.f32 %v1334_v17, %v1334_v17 }
  0xba   : > { %v1343_v43 = vsub.f32 %v1173_v24, %v316_v38  ;;  %v1346_v21 = vsub.f32 %v1176_v25, %v317_v39  ;;  %v430_v46 = vsel %vm206_vm0, %v378_v42, 0.0  ;;  %v433_v51 = vsel %vm206_vm0, %v379_v20, 0.0 }
  0xbb   : > { %428 = vadd.xlane.f32.xlu1 %v427_v35  ;;  %431 = vadd.xlane.f32.xlu0 %v430_v46  ;;  %v251_v47 = vpop.xlane.xlu0 %250  ;;  %v254_v50 = vpop.xlane.xlu1 %253 }
  0xbc   : > { %v318_v54 = vmul.f32 0.03125, %v251_v47  ;;  %v319_v8 = vmul.f32 0.03125, %v254_v50  ;;  %v380_v58 = vmul.f32 %v1343_v43, %v1343_v43  ;;  %v381_v24 = vmul.f32 %v1346_v21, %v1346_v21 }
  0xbe   : > { %v1355_v59 = vsub.f32 %v1183_v28, %v318_v54  ;;  %v1358_v25 = vsub.f32 %v1186_v29, %v319_v8  ;;  %v436_v62 = vsel %vm206_vm0, %v380_v58, 0.0  ;;  %v439_v4 = vsel %vm206_vm0, %v381_v24, 0.0 }
  0xbf   : > { %434 = vadd.xlane.f32.xlu1 %v433_v51  ;;  %437 = vadd.xlane.f32.xlu0 %v436_v62  ;;  %v257_v63 = vpop.xlane.xlu0 %256  ;;  %v260_v3 = vpop.xlane.xlu1 %259 }
  0xc0   : > { %v320_v6 = vmul.f32 0.03125, %v257_v63  ;;  %v321_v12 = vmul.f32 0.03125, %v260_v3  ;;  %v382_v14 = vmul.f32 %v1355_v59, %v1355_v59  ;;  %v383_v28 = vmul.f32 %v1358_v25, %v1358_v25 }
  0xc2   : > { %v1367_v15 = vsub.f32 %v1193_v32, %v320_v6  ;;  %v1370_v29 = vsub.f32 %v1196_v33, %v321_v12  ;;  %v442_v18 = vsel %vm206_vm0, %v382_v14, 0.0  ;;  %v445_v23 = vsel %vm206_vm0, %v383_v28, 0.0 }
  0xc3   : > { %440 = vadd.xlane.f32.xlu1 %v439_v4  ;;  %443 = vadd.xlane.f32.xlu0 %v442_v18  ;;  %v263_v19 = vpop.xlane.xlu0 %262  ;;  %v266_v22 = vpop.xlane.xlu1 %265 }
  0xc4   : > { %v322_v0 = vmul.f32 0.03125, %v263_v19  ;;  %v323_v16 = vmul.f32 0.03125, %v266_v22  ;;  %v384_v30 = vmul.f32 %v1367_v15, %v1367_v15  ;;  %v385_v32 = vmul.f32 %v1370_v29, %v1370_v29 }
  0xc6   : > { %v1379_v31 = vsub.f32 %v1203_v36, %v322_v0  ;;  %v1382_v33 = vsub.f32 %v1206_v37, %v323_v16  ;;  %v448_v34 = vsel %vm206_vm0, %v384_v30, 0.0  ;;  %v451_v39 = vsel %vm206_vm0, %v385_v32, 0.0 }
  0xc7   : > { %446 = vadd.xlane.f32.xlu1 %v445_v23  ;;  %449 = vadd.xlane.f32.xlu0 %v448_v34  ;;  %v269_v35 = vpop.xlane.xlu0 %268  ;;  %v272_v38 = vpop.xlane.xlu1 %271 }
  0xc8   : > { %v324_v42 = vmul.f32 0.03125, %v269_v35  ;;  %v325_v20 = vmul.f32 0.03125, %v272_v38  ;;  %v386_v46 = vmul.f32 %v1379_v31, %v1379_v31  ;;  %v387_v36 = vmul.f32 %v1382_v33, %v1382_v33 }
  0xca   : > { %v1391_v47 = vsub.f32 %v1213_v40, %v324_v42  ;;  %v1394_v37 = vsub.f32 %v1216_v41, %v325_v20  ;;  %v454_v50 = vsel %vm206_vm0, %v386_v46, 0.0  ;;  %v457_v8 = vsel %vm206_vm0, %v387_v36, 0.0 }
  0xcb   : > { %452 = vadd.xlane.f32.xlu1 %v451_v39  ;;  %455 = vadd.xlane.f32.xlu0 %v454_v50  ;;  %v275_v51 = vpop.xlane.xlu0 %274  ;;  %v278_v54 = vpop.xlane.xlu1 %277 }
  0xcc   : > { %v326_v58 = vmul.f32 0.03125, %v275_v51  ;;  %v327_v24 = vmul.f32 0.03125, %v278_v54  ;;  %v388_v62 = vmul.f32 %v1391_v47, %v1391_v47  ;;  %v389_v40 = vmul.f32 %v1394_v37, %v1394_v37 }
  0xce   : > { %v1403_v63 = vsub.f32 %v1223_v44, %v326_v58  ;;  %v1406_v41 = vsub.f32 %v1226_v45, %v327_v24  ;;  %v460_v3 = vsel %vm206_vm0, %v388_v62, 0.0  ;;  %v463_v12 = vsel %vm206_vm0, %v389_v40, 0.0 }
  0xcf   : > { %458 = vadd.xlane.f32.xlu1 %v457_v8  ;;  %461 = vadd.xlane.f32.xlu0 %v460_v3  ;;  %v281_v4 = vpop.xlane.xlu0 %280  ;;  %v284_v6 = vpop.xlane.xlu1 %283 }
  0xd0   : > { %v328_v14 = vmul.f32 0.03125, %v281_v4  ;;  %v329_v28 = vmul.f32 0.03125, %v284_v6  ;;  %v390_v18 = vmul.f32 %v1403_v63, %v1403_v63  ;;  %v391_v44 = vmul.f32 %v1406_v41, %v1406_v41 }
  0xd2   : > { %v1415_v19 = vsub.f32 %v1233_v48, %v328_v14  ;;  %v1418_v45 = vsub.f32 %v1236_v49, %v329_v28  ;;  %v466_v22 = vsel %vm206_vm0, %v390_v18, 0.0  ;;  %v469_v16 = vsel %vm206_vm0, %v391_v44, 0.0 }
  0xd3   : > { %464 = vadd.xlane.f32.xlu1 %v463_v12  ;;  %467 = vadd.xlane.f32.xlu0 %v466_v22  ;;  %v287_v23 = vpop.xlane.xlu0 %286  ;;  %v290_v0 = vpop.xlane.xlu1 %289 }
  0xd4   : > { %v330_v30 = vmul.f32 0.03125, %v287_v23  ;;  %v331_v32 = vmul.f32 0.03125, %v290_v0  ;;  %v392_v34 = vmul.f32 %v1415_v19, %v1415_v19  ;;  %v393_v48 = vmul.f32 %v1418_v45, %v1418_v45 }
  0xd6   : > { %v1427_v35 = vsub.f32 %v1243_v52, %v330_v30  ;;  %v1430_v49 = vsub.f32 %v1246_v53, %v331_v32  ;;  %v472_v38 = vsel %vm206_vm0, %v392_v34, 0.0  ;;  %v475_v20 = vsel %vm206_vm0, %v393_v48, 0.0 }
  0xd7   : > { %470 = vadd.xlane.f32.xlu1 %v469_v16  ;;  %473 = vadd.xlane.f32.xlu0 %v472_v38  ;;  %v293_v39 = vpop.xlane.xlu0 %292  ;;  %v296_v42 = vpop.xlane.xlu1 %295 }
  0xd8   : > { %v332_v46 = vmul.f32 0.03125, %v293_v39  ;;  %v333_v36 = vmul.f32 0.03125, %v296_v42  ;;  %v394_v50 = vmul.f32 %v1427_v35, %v1427_v35  ;;  %v395_v52 = vmul.f32 %v1430_v49, %v1430_v49 }
  0xda   : > { %v1439_v51 = vsub.f32 %v1253_v56, %v332_v46  ;;  %v1442_v53 = vsub.f32 %v1256_v57, %v333_v36  ;;  %v478_v54 = vsel %vm206_vm0, %v394_v50, 0.0  ;;  %v481_v24 = vsel %vm206_vm0, %v395_v52, 0.0 }
  0xdb   : > { %476 = vadd.xlane.f32.xlu1 %v475_v20  ;;  %479 = vadd.xlane.f32.xlu0 %v478_v54  ;;  %v299_v8 = vpop.xlane.xlu0 %298  ;;  %v302_v58 = vpop.xlane.xlu1 %301 }
  0xdc   : > { %v334_v62 = vmul.f32 0.03125, %v299_v8  ;;  %v335_v40 = vmul.f32 0.03125, %v302_v58  ;;  %v396_v3 = vmul.f32 %v1439_v51, %v1439_v51  ;;  %v397_v56 = vmul.f32 %v1442_v53, %v1442_v53  ;;  %v1467_v58 = vld [vmem:[%s1644_s1] ss:$0 sm:$0xff] }
  0xde   : > { %v1451_v4 = vsub.f32 %v1263_v60, %v334_v62  ;;  %v1454_v57 = vsub.f32 %v1266_v61, %v335_v40  ;;  %v484_v6 = vsel %vm206_vm0, %v396_v3, 0.0  ;;  %v487_v12 = vsel %vm206_vm0, %v397_v56, 0.0 }
  0xdf   : > { %482 = vadd.xlane.f32.xlu1 %v481_v24  ;;  %485 = vadd.xlane.f32.xlu0 %v484_v6  ;;  %v1473_v6 = vld [vmem:[%s1645_s2] ss:$0 sm:$0xff] }
  0xe0   : > { %v398_v14 = vmul.f32 %v1451_v4, %v1451_v4  ;;  %v399_v28 = vmul.f32 %v1454_v57, %v1454_v57 }
  0xe2   : > { %v490_v18 = vsel %vm206_vm0, %v398_v14, 0.0  ;;  %v493_v60 = vsel %vm206_vm0, %v399_v28, 0.0 }
  0xe3   : > { %488 = vadd.xlane.f32.xlu1 %v487_v12  ;;  %491 = vadd.xlane.f32.xlu0 %v490_v18 }
  0xe7   : > { %494 = vadd.xlane.f32.xlu1 %v493_v60 }
 0x134   : > { %v402_v61 = vpop.xlane.xlu0 %401 }
 0x135   : > { %v496_v44 = vmul.f32 0.03125, %v402_v61 }
 0x137   : > { %v528_v22 = vadd.f32 1e-05, %v496_v44 }
 0x138   : > { %v405_v23 = vpop.xlane.xlu1 %404  ;;  %v408_v0 = vpop.xlane.xlu0 %407 }
 0x139   : > { %1004 = vrsqrt.f32 %v528_v22  ;;  %v497_v16 = vmul.f32 0.03125, %v405_v23  ;;  %v498_v30 = vmul.f32 0.03125, %v408_v0 }
 0x13b   : > { %v529_v32 = vadd.f32 1e-05, %v497_v16  ;;  %v530_v34 = vadd.f32 1e-05, %v498_v30 }
 0x13c   : > { %v411_v48 = vpop.xlane.xlu1 %410  ;;  %v414_v38 = vpop.xlane.xlu0 %413 }
 0x13d   : > { %1006 = vrsqrt.f32 %v529_v32  ;;  %v499_v39 = vmul.f32 0.03125, %v411_v48  ;;  %v500_v42 = vmul.f32 0.03125, %v414_v38 }
 0x13e   : > { %1008 = vrsqrt.f32 %v530_v34 }
 0x13f   : > { %v531_v20 = vadd.f32 1e-05, %v499_v39  ;;  %v532_v46 = vadd.f32 1e-05, %v500_v42 }
 0x140   : > { %v417_v36 = vpop.xlane.xlu1 %416  ;;  %v420_v50 = vpop.xlane.xlu0 %419 }
 0x141   : > { %1010 = vrsqrt.f32 %v531_v20  ;;  %v501_v52 = vmul.f32 0.03125, %v417_v36  ;;  %v502_v54 = vmul.f32 0.03125, %v420_v50 }
 0x142   : > { %1012 = vrsqrt.f32 %v532_v46 }
 0x143   : > { %v1005_v8 = vpop.eup %1004  ;;  %v533_v24 = vadd.f32 1e-05, %v501_v52  ;;  %v534_v62 = vadd.f32 1e-05, %v502_v54 }
 0x144   : > { %v592_v40 = vmul.f32 %v1005_v8, %v1273_v10  ;;  %v423_v3 = vpop.xlane.xlu1 %422  ;;  %v426_v56 = vpop.xlane.xlu0 %425 }
 0x145   : > { %1014 = vrsqrt.f32 %v533_v24  ;;  %v503_v12 = vmul.f32 0.03125, %v423_v3  ;;  %v504_v14 = vmul.f32 0.03125, %v426_v56 }
 0x146   : > { %v631_v28 = vmul.f32 %v1467_v58, %v592_v40  ;;  %1016 = vrsqrt.f32 %v534_v62 }
 0x147   : > { %v1007_v18 = vpop.eup %1006  ;;  %v535_v60 = vadd.f32 1e-05, %v503_v12  ;;  %v536_v61 = vadd.f32 1e-05, %v504_v14 }
 0x148   : > { %v1009_v44 = vpop.eup %1008  ;;  %v670_v10 = vadd.f32 %v1473_v6, %v631_v28  ;;  %v593_v22 = vmul.f32 %v1007_v18, %v1283_v26  ;;  %v429_v23 = vpop.xlane.xlu1 %428 }
 0x149   : > { %v432_v0 = vpop.xlane.xlu0 %431  ;;  %v594_v16 = vmul.f32 %v1009_v44, %v1276_v11  ;;  %1018 = vrsqrt.f32 %v535_v60  ;;  %v505_v30 = vmul.f32 0.03125, %v429_v23 }
 0x14a   : > { %v506_v32 = vmul.f32 0.03125, %v432_v0  ;;  %v964_v34 = vpack.c.bf16 %v670_v10, %v670_v10  ;;  %v632_v48 = vmul.f32 %v1467_v58, %v593_v22  ;;  %1020 = vrsqrt.f32 %v536_v61 }
 0x14b   : > { %v1011_v38 = vpop.eup %1010  ;;  %v633_v26 = vmul.f32 %v1467_v58, %v594_v16  ;;  %v537_v39 = vadd.f32 1e-05, %v505_v30 }
 0x14c   : > { %v538_v42 = vadd.f32 1e-05, %v506_v32  ;;  %v1013_v20 = vpop.eup %1012  ;;  %831 = vst.msk [vmem:[%s1482_s26] sm:$0xf] %vm830_vm1, %v964_v34  ;;  %v671_v46 = vadd.f32 %v1473_v6, %v632_v48  ;;  %v595_v36 = vmul.f32 %v1011_v38, %v1286_v27  ;;  %v435_v11 = vpop.xlane.xlu1 %434 }
 0x14d   : > { %v438_v50 = vpop.xlane.xlu0 %437  ;;  %v672_v52 = vadd.f32 %v1473_v6, %v633_v26  ;;  %v596_v54 = vmul.f32 %v1013_v20, %v1295_v2  ;;  %1022 = vrsqrt.f32 %v537_v39  ;;  %v507_v8 = vmul.f32 0.03125, %v435_v11 }
 0x14e   : > { %v965_v24 = vpack.c.bf16 %v671_v46, %v671_v46  ;;  %v634_v62 = vmul.f32 %v1467_v58, %v595_v36  ;;  %1024 = vrsqrt.f32 %v538_v42  ;;  %v508_v40 = vmul.f32 0.03125, %v438_v50 }
 0x14f   : > { %v1015_v3 = vpop.eup %1014  ;;  %v966_v56 = vpack.c.bf16 %v672_v52, %v672_v52  ;;  %v635_v12 = vmul.f32 %v1467_v58, %v596_v54  ;;  %v539_v27 = vadd.f32 1e-05, %v507_v8 }
 0x150   : > { %v1017_v14 = vpop.eup %1016  ;;  %832 = vst.msk [vmem:[%s1482_s26 + $0x4] sm:$0xf] %vm830_vm1, %v965_v24  ;;  %v673_v28 = vadd.f32 %v1473_v6, %v634_v62  ;;  %v597_v2 = vmul.f32 %v1015_v3, %v1298_v5  ;;  %v540_v18 = vadd.f32 1e-05, %v508_v40  ;;  %v441_v60 = vpop.xlane.xlu1 %440 }
 0x151   : > { %v444_v61 = vpop.xlane.xlu0 %443  ;;  %833 = vst.msk [vmem:[%s1482_s26 + $0x8] sm:$0xf] %vm830_vm1, %v966_v56  ;;  %v674_v44 = vadd.f32 %v1473_v6, %v635_v12  ;;  %v598_v10 = vmul.f32 %v1017_v14, %v1307_v55  ;;  %1026 = vrsqrt.f32 %v539_v27  ;;  %v509_v22 = vmul.f32 0.03125, %v441_v60 }
 0x152   : > { %v967_v23 = vpack.c.bf16 %v673_v28, %v673_v28  ;;  %v636_v0 = vmul.f32 %v1467_v58, %v597_v2  ;;  %1028 = vrsqrt.f32 %v540_v18  ;;  %v510_v16 = vmul.f32 0.03125, %v444_v61 }
 0x153   : > { %v1019_v30 = vpop.eup %1018  ;;  %v968_v5 = vpack.c.bf16 %v674_v44, %v674_v44  ;;  %v637_v32 = vmul.f32 %v1467_v58, %v598_v10  ;;  %v541_v34 = vadd.f32 1e-05, %v509_v22 }
 0x154   : > { %v1021_v48 = vpop.eup %1020  ;;  %834 = vst.msk [vmem:[%s1482_s26 + $0xc] sm:$0xf] %vm830_vm1, %v967_v23  ;;  %v675_v38 = vadd.f32 %v1473_v6, %v636_v0  ;;  %v599_v55 = vmul.f32 %v1019_v30, %v1310_v9  ;;  %v542_v26 = vadd.f32 1e-05, %v510_v16  ;;  %v447_v39 = vpop.xlane.xlu1 %446 }
 0x155   : > { %v450_v42 = vpop.xlane.xlu0 %449  ;;  %835 = vst.msk [vmem:[%s1482_s26 + $0x10] sm:$0xf] %vm830_vm1, %v968_v5  ;;  %v676_v20 = vadd.f32 %v1473_v6, %v637_v32  ;;  %v600_v46 = vmul.f32 %v1021_v48, %v1319_v7  ;;  %1030 = vrsqrt.f32 %v541_v34  ;;  %v511_v36 = vmul.f32 0.03125, %v447_v39 }
 0x156   : > { %v969_v11 = vpack.c.bf16 %v675_v38, %v675_v38  ;;  %v638_v50 = vmul.f32 %v1467_v58, %v599_v55  ;;  %1032 = vrsqrt.f32 %v542_v26  ;;  %v512_v52 = vmul.f32 0.03125, %v450_v42 }
 0x157   : > { %v1023_v54 = vpop.eup %1022  ;;  %v970_v9 = vpack.c.bf16 %v676_v20, %v676_v20  ;;  %v639_v8 = vmul.f32 %v1467_v58, %v600_v46  ;;  %v543_v24 = vadd.f32 1e-05, %v511_v36 }
 0x158   : > { %v1025_v62 = vpop.eup %1024  ;;  %836 = vst.msk [vmem:[%s1482_s26 + $0x14] sm:$0xf] %vm830_vm1, %v969_v11  ;;  %v677_v40 = vadd.f32 %v1473_v6, %v638_v50  ;;  %v601_v7 = vmul.f32 %v1023_v54, %v1322_v13  ;;  %v544_v3 = vadd.f32 1e-05, %v512_v52  ;;  %v453_v56 = vpop.xlane.xlu1 %452 }
 0x159   : > { %v456_v12 = vpop.xlane.xlu0 %455  ;;  %837 = vst.msk [vmem:[%s1482_s26 + $0x18] sm:$0xf] %vm830_vm1, %v970_v9  ;;  %v678_v27 = vadd.f32 %v1473_v6, %v639_v8  ;;  %v602_v14 = vmul.f32 %v1025_v62, %v1331_v1  ;;  %1034 = vrsqrt.f32 %v543_v24  ;;  %v513_v28 = vmul.f32 0.03125, %v453_v56 }
 0x15a   : > { %v971_v2 = vpack.c.bf16 %v677_v40, %v677_v40  ;;  %v640_v18 = vmul.f32 %v1467_v58, %v601_v7  ;;  %1036 = vrsqrt.f32 %v544_v3  ;;  %v514_v60 = vmul.f32 0.03125, %v456_v12 }
 0x15b   : > { %v1027_v61 = vpop.eup %1026  ;;  %v972_v13 = vpack.c.bf16 %v678_v27, %v678_v27  ;;  %v641_v44 = vmul.f32 %v1467_v58, %v602_v14  ;;  %v545_v10 = vadd.f32 1e-05, %v513_v28 }
 0x15c   : > { %v1029_v22 = vpop.eup %1028  ;;  %838 = vst.msk [vmem:[%s1482_s26 + $0x1c] sm:$0xf] %vm830_vm1, %v971_v2  ;;  %v679_v23 = vadd.f32 %v1473_v6, %v640_v18  ;;  %v603_v1 = vmul.f32 %v1027_v61, %v1334_v17  ;;  %v546_v0 = vadd.f32 1e-05, %v514_v60  ;;  %v459_v16 = vpop.xlane.xlu1 %458 }
 0x15d   : > { %v462_v30 = vpop.xlane.xlu0 %461  ;;  %839 = vst.msk [vmem:[%s1482_s26 + $0x20] sm:$0xf] %vm830_vm1, %v972_v13  ;;  %v680_v5 = vadd.f32 %v1473_v6, %v641_v44  ;;  %v604_v32 = vmul.f32 %v1029_v22, %v1343_v43  ;;  %1038 = vrsqrt.f32 %v545_v10  ;;  %v515_v34 = vmul.f32 0.03125, %v459_v16 }
 0x15e   : > { %v973_v48 = vpack.c.bf16 %v679_v23, %v679_v23  ;;  %v642_v38 = vmul.f32 %v1467_v58, %v603_v1  ;;  %1040 = vrsqrt.f32 %v546_v0  ;;  %v516_v55 = vmul.f32 0.03125, %v462_v30 }
 0x15f   : > { %v1031_v26 = vpop.eup %1030  ;;  %v974_v17 = vpack.c.bf16 %v680_v5, %v680_v5  ;;  %v643_v39 = vmul.f32 %v1467_v58, %v604_v32  ;;  %v547_v42 = vadd.f32 1e-05, %v515_v34 }
 0x160   : > { %v1033_v20 = vpop.eup %1032  ;;  %840 = vst.msk [vmem:[%s1482_s26 + $0x24] sm:$0xf] %vm830_vm1, %v973_v48  ;;  %v681_v46 = vadd.f32 %v1473_v6, %v642_v38  ;;  %v605_v43 = vmul.f32 %v1031_v26, %v1346_v21  ;;  %v548_v36 = vadd.f32 1e-05, %v516_v55  ;;  %v465_v11 = vpop.xlane.xlu1 %464 }
 0x161   : > { %v468_v50 = vpop.xlane.xlu0 %467  ;;  %841 = vst.msk [vmem:[%s1482_s26 + $0x28] sm:$0xf] %vm830_vm1, %v974_v17  ;;  %v682_v52 = vadd.f32 %v1473_v6, %v643_v39  ;;  %v606_v54 = vmul.f32 %v1033_v20, %v1355_v59  ;;  %1042 = vrsqrt.f32 %v547_v42  ;;  %v517_v9 = vmul.f32 0.03125, %v465_v11 }
 0x162   : > { %v975_v8 = vpack.c.bf16 %v681_v46, %v681_v46  ;;  %v644_v24 = vmul.f32 %v1467_v58, %v605_v43  ;;  %1044 = vrsqrt.f32 %v548_v36  ;;  %v518_v62 = vmul.f32 0.03125, %v468_v50 }
 0x163   : > { %v1035_v40 = vpop.eup %1034  ;;  %v976_v21 = vpack.c.bf16 %v682_v52, %v682_v52  ;;  %v645_v7 = vmul.f32 %v1467_v58, %v606_v54  ;;  %v549_v3 = vadd.f32 1e-05, %v517_v9 }
 0x164   : > { %v1037_v56 = vpop.eup %1036  ;;  %842 = vst.msk [vmem:[%s1482_s26 + $0x2c] sm:$0xf] %vm830_vm1, %v975_v8  ;;  %v683_v12 = vadd.f32 %v1473_v6, %v644_v24  ;;  %v607_v59 = vmul.f32 %v1035_v40, %v1358_v25  ;;  %v550_v27 = vadd.f32 1e-05, %v518_v62  ;;  %v471_v14 = vpop.xlane.xlu1 %470 }
 0x165   : > { %v474_v28 = vpop.xlane.xlu0 %473  ;;  %843 = vst.msk [vmem:[%s1482_s26 + $0x30] sm:$0xf] %vm830_vm1, %v976_v21  ;;  %v684_v2 = vadd.f32 %v1473_v6, %v645_v7  ;;  %v608_v18 = vmul.f32 %v1037_v56, %v1367_v15  ;;  %1046 = vrsqrt.f32 %v549_v3  ;;  %v519_v60 = vmul.f32 0.03125, %v471_v14 }
 0x166   : > { %v977_v61 = vpack.c.bf16 %v683_v12, %v683_v12  ;;  %v646_v13 = vmul.f32 %v1467_v58, %v607_v59  ;;  %1048 = vrsqrt.f32 %v550_v27  ;;  %v520_v44 = vmul.f32 0.03125, %v474_v28 }
 0x167   : > { %v1039_v10 = vpop.eup %1038  ;;  %v978_v25 = vpack.c.bf16 %v684_v2, %v684_v2  ;;  %v647_v22 = vmul.f32 %v1467_v58, %v608_v18  ;;  %v551_v23 = vadd.f32 1e-05, %v519_v60 }
 0x168   : > { %v1041_v1 = vpop.eup %1040  ;;  %844 = vst.msk [vmem:[%s1482_s26 + $0x34] sm:$0xf] %vm830_vm1, %v977_v61  ;;  %v685_v0 = vadd.f32 %v1473_v6, %v646_v13  ;;  %v609_v15 = vmul.f32 %v1039_v10, %v1370_v29  ;;  %v552_v16 = vadd.f32 1e-05, %v520_v44  ;;  %v477_v30 = vpop.xlane.xlu1 %476 }
 0x169   : > { %v480_v5 = vpop.xlane.xlu0 %479  ;;  %845 = vst.msk [vmem:[%s1482_s26 + $0x38] sm:$0xf] %vm830_vm1, %v978_v25  ;;  %v686_v32 = vadd.f32 %v1473_v6, %v647_v22  ;;  %v610_v34 = vmul.f32 %v1041_v1, %v1379_v31  ;;  %1050 = vrsqrt.f32 %v551_v23  ;;  %v521_v48 = vmul.f32 0.03125, %v477_v30 }
 0x16a   : > { %v979_v38 = vpack.c.bf16 %v685_v0, %v685_v0  ;;  %v648_v55 = vmul.f32 %v1467_v58, %v609_v15  ;;  %1052 = vrsqrt.f32 %v552_v16  ;;  %v522_v26 = vmul.f32 0.03125, %v480_v5 }
 0x16b   : > { %v1043_v17 = vpop.eup %1042  ;;  %v980_v29 = vpack.c.bf16 %v686_v32, %v686_v32  ;;  %v649_v39 = vmul.f32 %v1467_v58, %v610_v34  ;;  %v553_v42 = vadd.f32 1e-05, %v521_v48 }
 0x16c   : > { %v1045_v20 = vpop.eup %1044  ;;  %846 = vst.msk [vmem:[%s1482_s26 + $0x3c] sm:$0xf] %vm830_vm1, %v979_v38  ;;  %v687_v46 = vadd.f32 %v1473_v6, %v648_v55  ;;  %v611_v31 = vmul.f32 %v1043_v17, %v1382_v33  ;;  %v554_v43 = vadd.f32 1e-05, %v522_v26  ;;  %v483_v36 = vpop.xlane.xlu1 %482 }
 0x16d   : > { %v486_v11 = vpop.xlane.xlu0 %485  ;;  %847 = vst.msk [vmem:[%s1482_s26 + $0x40] sm:$0xf] %vm830_vm1, %v980_v29  ;;  %v688_v50 = vadd.f32 %v1473_v6, %v649_v39  ;;  %v612_v52 = vmul.f32 %v1045_v20, %v1391_v47  ;;  %1054 = vrsqrt.f32 %v553_v42  ;;  %v523_v54 = vmul.f32 0.03125, %v483_v36 }
 0x16e   : > { %v981_v9 = vpack.c.bf16 %v687_v46, %v687_v46  ;;  %v650_v8 = vmul.f32 %v1467_v58, %v611_v31  ;;  %1056 = vrsqrt.f32 %v554_v43  ;;  %v524_v24 = vmul.f32 0.03125, %v486_v11 }
 0x16f   : > { %v1047_v62 = vpop.eup %1046  ;;  %v982_v33 = vpack.c.bf16 %v688_v50, %v688_v50  ;;  %v651_v40 = vmul.f32 %v1467_v58, %v612_v52  ;;  %v555_v21 = vadd.f32 1e-05, %v523_v54 }
 0x170   : > { %v1049_v7 = vpop.eup %1048  ;;  %848 = vst.msk [vmem:[%s1482_s26 + $0x44] sm:$0xf] %vm830_vm1, %v981_v9  ;;  %v689_v3 = vadd.f32 %v1473_v6, %v650_v8  ;;  %v613_v47 = vmul.f32 %v1047_v62, %v1394_v37  ;;  %v556_v56 = vadd.f32 1e-05, %v524_v24  ;;  %v489_v12 = vpop.xlane.xlu1 %488 }
 0x171   : > { %v492_v59 = vpop.xlane.xlu0 %491  ;;  %849 = vst.msk [vmem:[%s1482_s26 + $0x48] sm:$0xf] %vm830_vm1, %v982_v33  ;;  %v690_v27 = vadd.f32 %v1473_v6, %v651_v40  ;;  %v614_v14 = vmul.f32 %v1049_v7, %v1403_v63  ;;  %1058 = vrsqrt.f32 %v555_v21  ;;  %v525_v28 = vmul.f32 0.03125, %v489_v12 }
 0x172   : > { %v983_v2 = vpack.c.bf16 %v689_v3, %v689_v3  ;;  %v652_v18 = vmul.f32 %v1467_v58, %v613_v47  ;;  %1060 = vrsqrt.f32 %v556_v56  ;;  %v526_v60 = vmul.f32 0.03125, %v492_v59 }
 0x173   : > { %v1051_v61 = vpop.eup %1050  ;;  %v984_v37 = vpack.c.bf16 %v690_v27, %v690_v27  ;;  %v653_v13 = vmul.f32 %v1467_v58, %v614_v14  ;;  %v557_v44 = vadd.f32 1e-05, %v525_v28 }
 0x174   : > { %v1053_v10 = vpop.eup %1052  ;;  %850 = vst.msk [vmem:[%s1482_s26 + $0x4c] sm:$0xf] %vm830_vm1, %v983_v2  ;;  %v691_v25 = vadd.f32 %v1473_v6, %v652_v18  ;;  %v615_v63 = vmul.f32 %v1051_v61, %v1406_v41  ;;  %v558_v22 = vadd.f32 1e-05, %v526_v60  ;;  %v495_v23 = vpop.xlane.xlu1 %494 }
 0x175   : > { %851 = vst.msk [vmem:[%s1482_s26 + $0x50] sm:$0xf] %vm830_vm1, %v984_v37  ;;  %v692_v1 = vadd.f32 %v1473_v6, %v653_v13  ;;  %v616_v0 = vmul.f32 %v1053_v10, %v1415_v19  ;;  %1062 = vrsqrt.f32 %v557_v44  ;;  %v527_v15 = vmul.f32 0.03125, %v495_v23 }
 0x176   : > { %v985_v16 = vpack.c.bf16 %v691_v25, %v691_v25  ;;  %v654_v30 = vmul.f32 %v1467_v58, %v615_v63  ;;  %1064 = vrsqrt.f32 %v558_v22 }
 0x177   : > { %v1055_v5 = vpop.eup %1054  ;;  %v986_v32 = vpack.c.bf16 %v692_v1, %v692_v1  ;;  %v655_v41 = vmul.f32 %v1467_v58, %v616_v0  ;;  %v559_v34 = vadd.f32 1e-05, %v527_v15 }
 0x178   : > { %v1057_v48 = vpop.eup %1056  ;;  %852 = vst.msk [vmem:[%s1482_s26 + $0x54] sm:$0xf] %vm830_vm1, %v985_v16  ;;  %v693_v38 = vadd.f32 %v1473_v6, %v654_v30  ;;  %v617_v19 = vmul.f32 %v1055_v5, %v1418_v45 }
 0x179   : > { %853 = vst.msk [vmem:[%s1482_s26 + $0x58] sm:$0xf] %vm830_vm1, %v986_v32  ;;  %v694_v55 = vadd.f32 %v1473_v6, %v655_v41  ;;  %v618_v26 = vmul.f32 %v1057_v48, %v1427_v35  ;;  %1066 = vrsqrt.f32 %v559_v34 }
 0x17a   : > { %v987_v17 = vpack.c.bf16 %v693_v38, %v693_v38  ;;  %v656_v29 = vmul.f32 %v1467_v58, %v617_v19 }
 0x17b   : > { %v1059_v39 = vpop.eup %1058  ;;  %v988_v42 = vpack.c.bf16 %v694_v55, %v694_v55  ;;  %v657_v20 = vmul.f32 %v1467_v58, %v618_v26 }
 0x17c   : > { %v1061_v46 = vpop.eup %1060  ;;  %854 = vst.msk [vmem:[%s1482_s26 + $0x5c] sm:$0xf] %vm830_vm1, %v987_v17  ;;  %v695_v45 = vadd.f32 %v1473_v6, %v656_v29  ;;  %v619_v31 = vmul.f32 %v1059_v39, %v1430_v49 }
 0x17d   : > { %855 = vst.msk [vmem:[%s1482_s26 + $0x60] sm:$0xf] %vm830_vm1, %v988_v42  ;;  %v696_v35 = vadd.f32 %v1473_v6, %v657_v20  ;;  %v620_v43 = vmul.f32 %v1061_v46, %v1439_v51 }
 0x17e   : > { %v989_v36 = vpack.c.bf16 %v695_v45, %v695_v45  ;;  %v658_v11 = vmul.f32 %v1467_v58, %v619_v31 }
 0x17f   : > { %v1063_v50 = vpop.eup %1062  ;;  %v990_v52 = vpack.c.bf16 %v696_v35, %v696_v35  ;;  %v659_v54 = vmul.f32 %v1467_v58, %v620_v43 }
 0x180   : > { %v1065_v9 = vpop.eup %1064  ;;  %856 = vst.msk [vmem:[%s1482_s26 + $0x64] sm:$0xf] %vm830_vm1, %v989_v36  ;;  %v697_v49 = vadd.f32 %v1473_v6, %v658_v11  ;;  %v621_v8 = vmul.f32 %v1063_v50, %v1442_v53 }
 0x181   : > { %857 = vst.msk [vmem:[%s1482_s26 + $0x68] sm:$0xf] %vm830_vm1, %v990_v52  ;;  %v698_v51 = vadd.f32 %v1473_v6, %v659_v54  ;;  %v622_v24 = vmul.f32 %v1065_v9, %v1451_v4 }
 0x182   : > { %v991_v62 = vpack.c.bf16 %v697_v49, %v697_v49  ;;  %v660_v33 = vmul.f32 %v1467_v58, %v621_v8 }
 0x183   : > { %v1067_v40 = vpop.eup %1066  ;;  %v992_v21 = vpack.c.bf16 %v698_v51, %v698_v51  ;;  %v661_v7 = vmul.f32 %v1467_v58, %v622_v24 }
 0x184   : > { %858 = vst.msk [vmem:[%s1482_s26 + $0x6c] sm:$0xf] %vm830_vm1, %v991_v62  ;;  %v699_v53 = vadd.f32 %v1473_v6, %v660_v33  ;;  %v623_v3 = vmul.f32 %v1067_v40, %v1454_v57 }
 0x185   : > { %859 = vst.msk [vmem:[%s1482_s26 + $0x70] sm:$0xf] %vm830_vm1, %v992_v21  ;;  %v700_v47 = vadd.f32 %v1473_v6, %v661_v7 }
 0x186   : > { %v993_v4 = vpack.c.bf16 %v699_v53, %v699_v53  ;;  %v662_v56 = vmul.f32 %v1467_v58, %v623_v3 }
 0x187   : > { %v994_v12 = vpack.c.bf16 %v700_v47, %v700_v47 }
 0x188   : > { %860 = vst.msk [vmem:[%s1482_s26 + $0x74] sm:$0xf] %vm830_vm1, %v993_v4  ;;  %v701_v59 = vadd.f32 %v1473_v6, %v662_v56 }
 0x189   : > { %861 = vst.msk [vmem:[%s1482_s26 + $0x78] sm:$0xf] %vm830_vm1, %v994_v12 }
 0x18a   : > { %v995_v27 = vpack.c.bf16 %v701_v59, %v701_v59 }
 0x18c   : > { %862 = vst.msk [vmem:[%s1482_s26 + $0x7c] sm:$0xf] %vm830_vm1, %v995_v27 }
 0x18d PF: > { %s13_s12 = sadd.s32 1, %s1074_s12  }
 0x18e   : > { %p10_p4 = scmp.ge.s32.totalorder %s13_s12, 4  }
 0x190   :  { %12 = sbr.rel (!%p10_p4) target bundleno = 1 (0x1), region = 62 }

</bundles_post_ra>
